<compile_context>
chip_gen: v6e
topology: v6e:2x2x1
jax: 0.10.0
libtpu: 0.0.40
codegen_flags: <defaults>
</compile_context>

<pallas_src>
import jax
import jax.numpy as jnp
from jax import lax
from jax.experimental import pallas as pl
from jax.experimental.pallas import tpu as pltpu

_EPS = 1e-12          # torch.nn.functional.normalize default eps
_LANE = 128
_SUBLANE = 8


def _l2norm_kernel(x_ref, o_ref):
    # Block: (tile_b, C, ...spatial...); normalize along axis=1 (channels).
    x = x_ref[...].astype(jnp.float32)
    sq_sum = jnp.sum(x * x, axis=1, keepdims=True)
    # 1 / max(||x||, eps) == min(rsqrt(sum x^2), 1/eps); rsqrt runs on the EUP.
    inv_norm = jnp.minimum(lax.rsqrt(sq_sum), 1.0 / _EPS)
    o_ref[...] = (x * inv_norm).astype(o_ref.dtype)


# ---------------------------------------------------------------------------
# Per-generation VMEM sizing.
# ---------------------------------------------------------------------------
def _vmem_capacity_bytes():
    """Physical VMEM per TensorCore (128 MiB on v5e/v6e, 64 MiB on v7x)."""
    try:
        cap = int(pltpu.get_tpu_info().vmem_capacity_bytes)
        if cap > 0:
            return cap
    except Exception:
        pass
    return 64 * 1024 * 1024  # conservative default (v7x-sized)


def _vmem_limit_bytes():
    # 48 MiB on 64 MiB parts, 96 MiB on 128 MiB parts.
    return (_vmem_capacity_bytes() * 3) // 4


def _elem_budgets(itemsize):
    """(target_elems, max_elems) per block.

    target: per-grid-step DMA window (per direction) big enough that the
    ~0.35 us fixed step overhead is a small fraction of the step's HBM time
    on every generation (4 MiB on 64 MiB-VMEM parts, 8 MiB on 128 MiB parts).
    max: hard cap so double-buffered in+out windows + f32 temps fit VMEM.
    """
    cap = _vmem_capacity_bytes()
    target_bytes = cap // 16
    buf_budget = _vmem_limit_bytes() - 8 * 1024 * 1024   # headroom for scratch
    per_elem_vmem = 4 * itemsize + 8   # 2x in + 2x out (double-buffer) + f32 temps
    max_elems = max(1, buf_budget // per_elem_vmem)
    target_elems = max(1, target_bytes // itemsize)
    return target_elems, max_elems


# ---------------------------------------------------------------------------
# Tile selection.
# ---------------------------------------------------------------------------
def _choose_tiles_4d(b, c, rows, itemsize):
    """Tiles for the dense (B, C, rows, 128) layout: block (tile_b, C, tile_rows, 128)."""
    target_elems, max_elems = _elem_budgets(itemsize)
    goal = max(1, min(target_elems, max_elems))
    unit = c * _LANE                       # elems in one (1, C, 1, 128) slice
    rows_goal = max(1, goal // unit)       # row-groups per block (per batch row)

    if rows_goal >= rows:
        tile_rows = rows                   # full spatial extent (== full dim, any size ok)
    else:
        tile_rows = (rows_goal // _SUBLANE) * _SUBLANE
        if tile_rows < _SUBLANE:
            tile_rows = min(_SUBLANE, rows)   # rows < 8 -> full dim
        tile_rows = min(tile_rows, rows)

    tile_b = 1
    if tile_rows == rows:
        # Block spans the whole spatial extent: pack batch rows to reach the
        # byte target (no ">=2 grid steps" cap -- tensors that fit one block
        # are tiny enough that a single step is already near-optimal).
        tile_b = max(1, min(b, rows_goal // max(rows, 1)))
    return tile_b, tile_rows


def _choose_tiles_3d(b, c, hw, itemsize):
    """Tiles for the (B, C, HW) fallback layout: block (tile_b, C, tile_hw)."""
    target_elems, max_elems = _elem_budgets(itemsize)
    goal = max(1, min(target_elems, max_elems))
    unit = c * _LANE
    groups = pl.cdiv(hw, _LANE)            # 128-lane groups incl. ragged tail
    groups_goal = max(1, goal // unit)

    if groups_goal >= groups:
        tile_hw = hw                        # full dim (need not be a 128 multiple)
        tile_b = max(1, min(b, goal // max(c * hw, 1)))
    else:
        tile_hw = groups_goal * _LANE       # multiple of 128, < hw by construction
        tile_b = 1
    return tile_b, tile_hw


# ---------------------------------------------------------------------------
# Wrapper.
# ---------------------------------------------------------------------------
def l2_normalize_nchw(x):
    """L2-normalize an NCHW array along dim=1 (channels), like F.normalize(p=2, dim=1)."""
    b, c, h, w = x.shape
    hw = h * w
    itemsize = jnp.dtype(x.dtype).itemsize
    vmem_limit = _vmem_limit_bytes()

    cost = pl.CostEstimate(
        flops=3 * b * c * hw,               # square + accumulate + scale
        transcendentals=b * hw,             # one rsqrt per spatial position
        bytes_accessed=2 * b * c * hw * itemsize,
    )
    cparams = pltpu.CompilerParams(
        dimension_semantics=("parallel", "parallel"),
        vmem_limit_bytes=vmem_limit,
    )

    if hw % _LANE == 0:
        # Dense layout: spatial on sublane+lane, channels on a leading axis.
        rows = hw // _LANE
        x4 = x.reshape(b, c, rows, _LANE)
        tile_b, tile_rows = _choose_tiles_4d(b, c, rows, itemsize)
        grid = (pl.cdiv(b, tile_b), pl.cdiv(rows, tile_rows))
        block = (tile_b, c, tile_rows, _LANE)
        out = pl.pallas_call(
            _l2norm_kernel,
            out_shape=jax.ShapeDtypeStruct((b, c, rows, _LANE), x.dtype),
            grid_spec=pltpu.PrefetchScalarGridSpec(
                num_scalar_prefetch=0,
                grid=grid,
                in_specs=[pl.BlockSpec(block, lambda i, j: (i, 0, j, 0))],
                out_specs=pl.BlockSpec(block, lambda i, j: (i, 0, j, 0)),
            ),
            compiler_params=cparams,
            cost_estimate=cost,
        )(x4)
        return out.reshape(b, c, h, w)

    # Ragged HW: channels on sublane, lane-tiled HW; Pallas handles the partial
    # last block (OOB lanes/batches are independent along the C-reduction and
    # their stores are dropped), so no wrapper-side pad/slice HBM passes.
    x3 = x.reshape(b, c, hw)
    tile_b, tile_hw = _choose_tiles_3d(b, c, hw, itemsize)
    grid = (pl.cdiv(b, tile_b), pl.cdiv(hw, tile_hw))
    block = (tile_b, c, tile_hw)
    out = pl.pallas_call(
        _l2norm_kernel,
        out_shape=jax.ShapeDtypeStruct((b, c, hw), x.dtype),
        grid_spec=pltpu.PrefetchScalarGridSpec(
            num_scalar_prefetch=0,
            grid=grid,
            in_specs=[pl.BlockSpec(block, lambda i, j: (i, 0, j))],
            out_specs=pl.BlockSpec(block, lambda i, j: (i, 0, j)),
        ),
        compiler_params=cparams,
        cost_estimate=cost,
    )(x3)
    return out.reshape(b, c, h, w)


if __name__ == "__main__":
    key = jax.random.PRNGKey(0)
    x = jax.random.normal(key, (2, 4, 16, 16), dtype=jnp.float32)  # NCHW

    y = jax.block_until_ready(l2_normalize_nchw(x))

    # Reference check (plain JAX, matches torch.nn.functional.normalize semantics).
    norm = jnp.maximum(jnp.sqrt(jnp.sum(x * x, axis=1, keepdims=True)), _EPS)
    ref = x / norm
    assert y.shape == x.shape and y.dtype == x.dtype
    assert jnp.allclose(y, ref, atol=1e-6, rtol=1e-5)

    print("KERNEL_OK")
</pallas_src>

<mosaic_0001>
module attributes {stable_mosaic.version = 11 : i64} {
  func.func @_l2norm_kernel(%arg0: i32, %arg1: i32, %arg2: memref<2x4x2x128xf32, #tpu.memory_space<vmem>>, %arg3: memref<2x4x2x128xf32, #tpu.memory_space<vmem>>) attributes {dimension_semantics = [#tpu.dimension_semantics<parallel>, #tpu.dimension_semantics<parallel>], iteration_bounds = array<i64: 1, 1>, scalar_prefetch = 0 : i64, scratch_operands = 0 : i64, tpu.core_type = #tpu.core_type<tc>, window_params = [{transform_indices = @transform_0, window_bounds = array<i64: 2, 4, 2, 128>}, {transform_indices = @transform_1, window_bounds = array<i64: 2, 4, 2, 128>}]} {
    %c0 = arith.constant 0 : index
    %c0_0 = arith.constant 0 : index
    %c0_1 = arith.constant 0 : index
    %c0_2 = arith.constant 0 : index
    %0 = vector.load %arg2[%c0, %c0_0, %c0_1, %c0_2] : memref<2x4x2x128xf32, #tpu.memory_space<vmem>>, vector<2x4x2x128xf32>
    %1 = arith.mulf %0, %0 : vector<2x4x2x128xf32>
    %cst = arith.constant dense<0.000000e+00> : vector<2x2x128xf32>
    %2 = vector.multi_reduction <add>, %1, %cst [1] : vector<2x4x2x128xf32> to vector<2x2x128xf32>
    %3 = vector.shape_cast %2 : vector<2x2x128xf32> to vector<2x1x2x128xf32>
    %4 = math.rsqrt %3 : vector<2x1x2x128xf32>
    %cst_3 = arith.constant 9.99999995E+11 : f32
    %5 = vector.broadcast %cst_3 : f32 to vector<2x1x2x128xf32>
    %6 = arith.minimumf %4, %5 : vector<2x1x2x128xf32>
    %7 = vector.broadcast %6 : vector<2x1x2x128xf32> to vector<2x4x2x128xf32>
    %8 = arith.mulf %0, %7 : vector<2x4x2x128xf32>
    %c0_4 = arith.constant 0 : index
    %c0_5 = arith.constant 0 : index
    %c0_6 = arith.constant 0 : index
    %c0_7 = arith.constant 0 : index
    %9 = vector.load %arg3[%c0_4, %c0_5, %c0_6, %c0_7] : memref<2x4x2x128xf32, #tpu.memory_space<vmem>>, vector<2x4x2x128xf32>
    tpu.vector_store %arg3[%c0_4, %c0_5, %c0_6, %c0_7], %8 {strides = array<i32>} : memref<2x4x2x128xf32, #tpu.memory_space<vmem>>, vector<2x4x2x128xf32>,
    return
  }
  func.func @transform_0(%arg0: i32, %arg1: i32) -> (i32, i32, i32, i32) {
    %c0_i32 = arith.constant 0 : i32
    %c0_i32_0 = arith.constant 0 : i32
    %c0_i32_1 = arith.constant 0 : i32
    return %arg0, %c0_i32, %arg1, %c0_i32_0 : i32, i32, i32, i32
  }
  func.func @transform_1(%arg0: i32, %arg1: i32) -> (i32, i32, i32, i32) {
    %c0_i32 = arith.constant 0 : i32
    %c0_i32_0 = arith.constant 0 : i32
    %c0_i32_1 = arith.constant 0 : i32
    return %arg0, %c0_i32, %arg1, %c0_i32_0 : i32, i32, i32, i32
  }
}

</mosaic_0001>

<bundles_post_ra>
// kernel: tpu_custom_call.1
= control target key start
LH: loop header
LB: loop body
LE: loop exit
PB: predicated region body
PF: predicated region fallthrough
CT: control target
= control target key end

     0   :  { %6 = vsyncpa [#allocation3], 0  ;;  %s177_s0 = inlined_call_operand.hbm [shape: f32[2,4,2,128], index: 0, kind: input, shape index: {}]   ;;  %s178_s1 = inlined_call_operand.hbm [shape: f32[2,4,2,128], index: 1, kind: output, shape index: {}]  }
   0x1   :  { %7 = vsyncpa [#allocation4], 0  ;;  %s143_s6 = smov [#allocation2]  }
   0x2   :  { %s13_s7 = sshll.u32 %s143_s6, 4  ;;  %s14_s7 = int_to_ptr.vmem [resolvable:$true] %s13_s7 }
   0x3   :  { %s107_s8 = scalar_lea.vmem %s14_s7, 256  ;;  %p112_p1 = scmp.lt.s32.totalorder %s14_s7, %s14_s7 }
   0x4   :  { %p108_p0 = scmp.ne.s32.totalorder %s14_s7, %s107_s8  ;;  %p113_p2 = scmp.lt.s32.totalorder %s107_s8, %s107_s8 }
   0x6   :  { %p114_p3 = por %p113_p2, %p112_p1 }
   0x8   :  { %p115_p4 = pnand %p114_p3, %p108_p0 }
   0xa   :  { %118 = shalt.err (!%p115_p4)
}
   0xb   :  { %s144_s9 = smov 32   ;;  %s145_s10 = smov 2  }
   0xc   :  { %19 = dma.hbm_to_vmem [thread:$0]  %s177_s0, 256, %s14_s7, [#allocation3], %s144_s9, %s144_s9, %s145_s10  }
   0xd   :  { %139 = dma.done.wait [#allocation3], 256  }
   0xe   :  { %140 = vsyncadd [#allocation3], 4294967040  ;;  %vm39_vm0 = vcmask 1041408   ;;  %v23_v0 = vld [vmem:[#allocation2] sm:$0x3]  ;;  %s146_s0 = smov [#allocation5]  }
   0xf   :  { %v24_v1 = vld [vmem:[#allocation2 + $0x2] sm:$0x3]  ;;  %v25_v2 = vld [vmem:[#allocation2 + $0x4] sm:$0x3]  ;;  %v26_v3 = vld [vmem:[#allocation2 + $0x6] sm:$0x3]  ;;  %v31_v4 = vmul.f32 %v23_v0, %v23_v0 }
  0x10   :  { %v32_v5 = vmul.f32 %v24_v1, %v24_v1  ;;  %v33_v6 = vmul.f32 %v25_v2, %v25_v2  ;;  %v27_v7 = vld [vmem:[#allocation2 + $0x8] sm:$0x3]  ;;  %v28_v8 = vld [vmem:[#allocation2 + $0xa] sm:$0x3]  ;;  %v34_v9 = vmul.f32 %v26_v3, %v26_v3  ;;  %v29_v10 = vld [vmem:[#allocation2 + $0xc] sm:$0x3] }
  0x11   :  { %v30_v11 = vld [vmem:[#allocation2 + $0xe] sm:$0x3]  ;;  %v35_v12 = vmul.f32 %v27_v7, %v27_v7  ;;  %v36_v13 = vmul.f32 %v28_v8, %v28_v8  ;;  %v40_v14 = vsel %vm39_vm0, %v31_v4, 0.0  ;;  %v37_v17 = vmul.f32 %v29_v10, %v29_v10  ;;  %s79_s13 = sshll.u32 %s146_s0, 4  ;;  %s80_s13 = int_to_ptr.vmem [resolvable:$true] %s79_s13 }
  0x12   :  { %v41_v15 = vsel %vm39_vm0, %v32_v5, 0.0  ;;  %v43_v16 = vsel %vm39_vm0, %v33_v6, 0.0  ;;  %v38_v19 = vmul.f32 %v30_v11, %v30_v11  ;;  %v45_v21 = vsel %vm39_vm0, %v34_v9, 0.0  ;;  %s119_s14 = scalar_lea.vmem %s80_s13, 256  ;;  %p124_p6 = scmp.lt.s32.totalorder %s80_s13, %s80_s13 }
  0x13   :  { %v42_v18 = vadd.f32 %v41_v15, %v40_v14  ;;  %v47_v20 = vsel %vm39_vm0, %v35_v12, 0.0  ;;  %v48_v22 = vsel %vm39_vm0, %v36_v13, 0.0  ;;  %v50_v23 = vsel %vm39_vm0, %v37_v17, 0.0  ;;  %p120_p5 = scmp.ne.s32.totalorder %s80_s13, %s119_s14  ;;  %p125_p7 = scmp.lt.s32.totalorder %s119_s14, %s119_s14 }
  0x14   :  { %v49_v25 = vadd.f32 %v48_v22, %v47_v20  ;;  %v52_v26 = vsel %vm39_vm0, %v38_v19, 0.0 }
  0x15   :  { %v44_v24 = vadd.f32 %v43_v16, %v42_v18  ;;  %p126_p8 = por %p125_p7, %p124_p6 }
  0x16   :  { %v51_v28 = vadd.f32 %v50_v23, %v49_v25 }
  0x17   :  { %v46_v27 = vadd.f32 %v45_v21, %v44_v24  ;;  %p127_p9 = pnand %p126_p8, %p120_p5 }
  0x18   :  { %v53_v29 = vadd.f32 %v52_v26, %v51_v28 }
  0x19   :  { %95 = vrsqrt.f32 %v46_v27 }
  0x1a   :  { %97 = vrsqrt.f32 %v53_v29 }
  0x26   :  { %v96_v30 = vpop.eup %95 }
  0x27   :  { %v56_v31 = vmin.f32 %v96_v30, 1e+12  ;;  %v98_v32 = vpop.eup %97 }
  0x28   :  { %v57_v37 = vmin.f32 %v98_v32, 1e+12 }
  0x29   :  { %v58_v33 = vmul.f32 %v56_v31, %v23_v0  ;;  %v59_v34 = vmul.f32 %v56_v31, %v24_v1  ;;  %v60_v35 = vmul.f32 %v56_v31, %v25_v2  ;;  %v61_v36 = vmul.f32 %v56_v31, %v26_v3 }
  0x2a   :  { %v62_v38 = vmul.f32 %v57_v37, %v27_v7  ;;  %v63_v39 = vmul.f32 %v57_v37, %v28_v8  ;;  %v64_v40 = vmul.f32 %v57_v37, %v29_v10  ;;  %v65_v41 = vmul.f32 %v57_v37, %v30_v11 }
  0x2b   :  { %66 = vst [vmem:[#allocation5] sm:$0x3] %v58_v33  ;;  %67 = vst [vmem:[#allocation5 + $0x2] sm:$0x3] %v59_v34 }
  0x2c   :  { %68 = vst [vmem:[#allocation5 + $0x4] sm:$0x3] %v60_v35  ;;  %69 = vst [vmem:[#allocation5 + $0x6] sm:$0x3] %v61_v36 }
  0x2d   :  { %70 = vst [vmem:[#allocation5 + $0x8] sm:$0x3] %v62_v38  ;;  %71 = vst [vmem:[#allocation5 + $0xa] sm:$0x3] %v63_v39 }
  0x2e   :  { %72 = vst [vmem:[#allocation5 + $0xc] sm:$0x3] %v64_v40  ;;  %73 = vst [vmem:[#allocation5 + $0xe] sm:$0x3] %v65_v41 }
  0x2f   :  { %130 = shalt.err (!%p127_p9)
}
  0x30   :  { %85 = dma.vmem_to_hbm [thread:$0]  %s80_s13, 256, %s178_s1, [#allocation4], %s144_s9, %s144_s9, %s145_s10  }
  0x31   :  { %141 = dma.done.wait [#allocation4], 256  }
  0x32   :  { %142 = vsyncadd [#allocation4], 4294967040 }
  0x33   :  { %89 = vsyncpa [#allocation3], 1 }
  0x34   :  { %90 = vsyncpa [#allocation4], 1 }

</bundles_post_ra>
